<compile_context>
chip_gen: v7x
topology: tpu7x:2x2x1
jax: 0.10.0
libtpu: 0.0.40
codegen_flags: <defaults>
</compile_context>

<pallas_src>
import functools

import jax
import jax.numpy as jnp
from jax.experimental import pallas as pl
from jax.experimental.pallas import tpu as pltpu

INPUT_SIZE = 10
HIDDEN_SIZE = 20
OUTPUT_SIZE = 5


def mlp_softmax_kernel(x_ref, w1_ref, b1_ref, w2_ref, b2_ref, o_ref):
    """x_ref: (in, tb)   -- features on sublanes, batch on the 128-lane axis
    w1_ref: (hidden, in), b1_ref: (hidden, 1)
    w2_ref: (out, hidden), b2_ref: (out, 1)
    o_ref : (out, tb)    -- lane-dense output block"""
    # --- Linear 1 + ReLU (MXU + VPU) ---
    h = jnp.dot(w1_ref[...], x_ref[...], preferred_element_type=jnp.float32)
    h = jnp.maximum(h + b1_ref[...], 0.0)

    # --- Linear 2 ---
    logits = jnp.dot(w2_ref[...], h, preferred_element_type=jnp.float32) + b2_ref[...]

    # --- Softmax over the feature axis (axis 0 here == torch dim=1), stable ---
    m = jnp.max(logits, axis=0, keepdims=True)
    e = jnp.exp(logits - m)
    denom = jnp.sum(e, axis=0, keepdims=True)
    # EUP approx reciprocal (separate issue slot) + one Newton step:
    # ~f32-accurate without a VALU divide (neutral but free).
    inv = pl.reciprocal(denom, approx=True)
    inv = inv * (2.0 - denom * inv)
    o_ref[...] = (e * inv).astype(o_ref.dtype)


def prepare_params(w1, b1, w2, b2):
    """One-time (load-time) parameter prep.  PyTorch nn.Linear weights are
    already in the (out, in) layout the lane-dense kernel wants, so only the
    biases are reshaped to (out, 1) for lane broadcast.  Call ONCE at load."""
    return (
        jnp.asarray(w1, jnp.float32),                 # (hidden, in)
        jnp.asarray(b1, jnp.float32).reshape(-1, 1),  # (hidden, 1)
        jnp.asarray(w2, jnp.float32),                 # (out, hidden)
        jnp.asarray(b2, jnp.float32).reshape(-1, 1),  # (out, 1)
    )


def _choose_tile(batch: int, tile_b: int) -> int:
    """Pick the batch tile (lane axis).  Must be a multiple of 128 unless it
    spans the whole batch (full-extent blocks are always legal)."""
    if batch < 256:
        # Single full-extent block when it fits; too small to split across TCs.
        return batch if batch <= tile_b else max(128, (tile_b // 128) * 128)
    tb = max(128, (min(tile_b, batch) // 128) * 128)
    # Guarantee >= 2 grid steps so the "parallel" batch axis can feed both
    # TensorCores on v7x (neutral on single-TC v5e / v6e).
    half = (((batch + 1) // 2) + 127) // 128 * 128
    return min(tb, half)


@functools.partial(jax.jit, static_argnames=("tile_b",))
def simple_test_model_forward(x, w1, b1_2d, w2, b2_2d, *, tile_b=8192):
    """x: (B, in) f32 (PyTorch layout).  Params prepped by `prepare_params`.
    Returns softmax probabilities of shape (B, out)."""
    batch, in_size = x.shape
    hidden = w1.shape[0]
    out_size = w2.shape[0]

    # Layout plumbing (wrapper-side): put batch on the 128-lane axis.
    x_t = x.T                                   # (in, B)

    tb = _choose_tile(batch, tile_b)
    grid = (pl.cdiv(batch, tb),)

    # Advisory cost estimate so XLA schedules this small call sensibly.
    cost = pl.CostEstimate(
        flops=2 * batch * (in_size * hidden + hidden * out_size),
        transcendentals=batch * out_size,
        bytes_accessed=4 * (batch * (in_size + out_size)
                            + in_size * hidden + hidden
                            + hidden * out_size + out_size),
    )

    out_t = pl.pallas_call(
        mlp_softmax_kernel,
        out_shape=jax.ShapeDtypeStruct((out_size, batch), jnp.float32),
        grid_spec=pltpu.PrefetchScalarGridSpec(
            num_scalar_prefetch=0,
            grid=grid,
            in_specs=[
                pl.BlockSpec((in_size, tb), lambda i: (0, i)),       # x tile (lane-dense)
                pl.BlockSpec((hidden, in_size), lambda i: (0, 0)),   # W1 (resident)
                pl.BlockSpec((hidden, 1), lambda i: (0, 0)),         # b1
                pl.BlockSpec((out_size, hidden), lambda i: (0, 0)),  # W2 (resident)
                pl.BlockSpec((out_size, 1), lambda i: (0, 0)),       # b2
            ],
            out_specs=pl.BlockSpec((out_size, tb), lambda i: (0, i)),
        ),
        compiler_params=pltpu.CompilerParams(
            dimension_semantics=("parallel",),   # batch tiles are independent
        ),
        cost_estimate=cost,
    )(x_t, w1, b1_2d, w2, b2_2d)

    return out_t.T                               # (B, out)


@jax.jit
def _xla_forward(x, w1, b1_2d, w2, b2_2d):
    h = jnp.maximum(x @ w1.T + b1_2d[:, 0], 0.0)
    return jax.nn.softmax(h @ w2.T + b2_2d[:, 0], axis=1)


def simple_test_model_forward_auto(x, w1, b1_2d, w2, b2_2d,
                                   *, small_batch_threshold=2048, tile_b=8192):
    """Per perf review: at small B the pallas_call dispatch itself dominates
    and XLA fuses this tiny MLP at roofline, so route small batches to plain
    XLA and keep the Pallas kernel for large batches."""
    if x.shape[0] < small_batch_threshold:
        return _xla_forward(x, w1, b1_2d, w2, b2_2d)
    return simple_test_model_forward(x, w1, b1_2d, w2, b2_2d, tile_b=tile_b)


if __name__ == "__main__":
    input_size, hidden_size, output_size = INPUT_SIZE, HIDDEN_SIZE, OUTPUT_SIZE

    key = jax.random.PRNGKey(0)
    kx1, kx2, kw1, kb1, kw2, kb2 = jax.random.split(key, 6)

    # PyTorch-style parameter shapes: (out, in) weights, (out,) biases.
    w1 = jax.random.normal(kw1, (hidden_size, input_size), dtype=jnp.float32) * 0.1
    b1 = jax.random.normal(kb1, (hidden_size,), dtype=jnp.float32) * 0.1
    w2 = jax.random.normal(kw2, (output_size, hidden_size), dtype=jnp.float32) * 0.1
    b2 = jax.random.normal(kb2, (output_size,), dtype=jnp.float32) * 0.1

    # One-time load-time prep (hoisted out of the forward path).
    params = prepare_params(w1, b1, w2, b2)

    def torch_ref(x):
        h = jnp.maximum(x @ w1.T + b1, 0.0)
        return jax.nn.softmax(h @ w2.T + b2, axis=1)

    # (a) tiny batch -> single full-extent tile.
    x_small = jax.random.normal(kx1, (8, input_size), dtype=jnp.float32)
    out_small = jax.block_until_ready(simple_test_model_forward(x_small, *params))
    assert out_small.shape == (8, output_size)
    assert jnp.allclose(out_small, torch_ref(x_small), atol=1e-5, rtol=1e-5), \
        float(jnp.max(jnp.abs(out_small - torch_ref(x_small))))
    assert jnp.allclose(jnp.sum(out_small, axis=1), 1.0, atol=1e-5)

    # (b) ragged batch spanning several grid steps (128-wide tiles, masked edge).
    x_ragged = jax.random.normal(kx2, (300, input_size), dtype=jnp.float32)
    out_ragged = jax.block_until_ready(
        simple_test_model_forward(x_ragged, *params, tile_b=128))
    assert out_ragged.shape == (300, output_size)
    assert jnp.allclose(out_ragged, torch_ref(x_ragged), atol=1e-5, rtol=1e-5), \
        float(jnp.max(jnp.abs(out_ragged - torch_ref(x_ragged))))
    assert jnp.allclose(jnp.sum(out_ragged, axis=1), 1.0, atol=1e-5)

    print("KERNEL_OK")
</pallas_src>

<mosaic_0001>
module attributes {stable_mosaic.version = 11 : i64} {
  func.func @mlp_softmax_kernel(%arg0: i32, %arg1: memref<10x8xf32, #tpu.memory_space<vmem>>, %arg2: memref<20x10xf32, #tpu.memory_space<vmem>>, %arg3: memref<20x1xf32, #tpu.memory_space<vmem>>, %arg4: memref<5x20xf32, #tpu.memory_space<vmem>>, %arg5: memref<5x1xf32, #tpu.memory_space<vmem>>, %arg6: memref<5x8xf32, #tpu.memory_space<vmem>>) attributes {dimension_semantics = [#tpu.dimension_semantics<parallel>], iteration_bounds = array<i64: 1>, scalar_prefetch = 0 : i64, scratch_operands = 0 : i64, tpu.core_type = #tpu.core_type<tc>, window_params = [{transform_indices = @transform_0, window_bounds = array<i64: 10, 8>}, {pipeline_mode = #tpu.pipeline_mode<synchronous>, transform_indices = @transform_1, window_bounds = array<i64: 20, 10>}, {pipeline_mode = #tpu.pipeline_mode<synchronous>, transform_indices = @transform_2, window_bounds = array<i64: 20, 1>}, {pipeline_mode = #tpu.pipeline_mode<synchronous>, transform_indices = @transform_3, window_bounds = array<i64: 5, 20>}, {pipeline_mode = #tpu.pipeline_mode<synchronous>, transform_indices = @transform_4, window_bounds = array<i64: 5, 1>}, {transform_indices = @transform_5, window_bounds = array<i64: 5, 8>}]} {
    %c0 = arith.constant 0 : index
    %c0_0 = arith.constant 0 : index
    %0 = vector.load %arg2[%c0, %c0_0] : memref<20x10xf32, #tpu.memory_space<vmem>>, vector<20x10xf32>
    %c0_1 = arith.constant 0 : index
    %c0_2 = arith.constant 0 : index
    %1 = vector.load %arg1[%c0_1, %c0_2] : memref<10x8xf32, #tpu.memory_space<vmem>>, vector<10x8xf32>
    %cst = arith.constant dense<0.000000e+00> : vector<20x8xf32>
    %2 = tpu.matmul %0, %1, %cst {dimension_numbers = #tpu.dot_dimension_numbers<[1], [0], [0], [1], [0, 0, 1, 1], [], []>} : vector<20x10xf32>, vector<10x8xf32>, vector<20x8xf32> -> vector<20x8xf32>
    %c0_3 = arith.constant 0 : index
    %c0_4 = arith.constant 0 : index
    %3 = vector.load %arg3[%c0_3, %c0_4] : memref<20x1xf32, #tpu.memory_space<vmem>>, vector<20x1xf32>
    %4 = vector.broadcast %3 : vector<20x1xf32> to vector<20x8xf32>
    %5 = arith.addf %2, %4 : vector<20x8xf32>
    %cst_5 = arith.constant 0.000000e+00 : f32
    %6 = vector.broadcast %cst_5 : f32 to vector<20x8xf32>
    %7 = arith.maximumf %5, %6 : vector<20x8xf32>
    %c0_6 = arith.constant 0 : index
    %c0_7 = arith.constant 0 : index
    %8 = vector.load %arg4[%c0_6, %c0_7] : memref<5x20xf32, #tpu.memory_space<vmem>>, vector<5x20xf32>
    %cst_8 = arith.constant dense<0.000000e+00> : vector<5x8xf32>
    %9 = tpu.matmul %8, %7, %cst_8 {dimension_numbers = #tpu.dot_dimension_numbers<[1], [0], [0], [1], [0, 0, 1, 1], [], []>} : vector<5x20xf32>, vector<20x8xf32>, vector<5x8xf32> -> vector<5x8xf32>
    %c0_9 = arith.constant 0 : index
    %c0_10 = arith.constant 0 : index
    %10 = vector.load %arg5[%c0_9, %c0_10] : memref<5x1xf32, #tpu.memory_space<vmem>>, vector<5x1xf32>
    %11 = vector.broadcast %10 : vector<5x1xf32> to vector<5x8xf32>
    %12 = arith.addf %9, %11 : vector<5x8xf32>
    %cst_11 = arith.constant dense<0xFF800000> : vector<8xf32>
    %13 = vector.multi_reduction <maximumf>, %12, %cst_11 [0] : vector<5x8xf32> to vector<8xf32>
    %14 = vector.shape_cast %13 : vector<8xf32> to vector<1x8xf32>
    %15 = vector.broadcast %14 : vector<1x8xf32> to vector<5x8xf32>
    %16 = arith.subf %12, %15 : vector<5x8xf32>
    %17 = math.exp %16 : vector<5x8xf32>
    %cst_12 = arith.constant dense<0.000000e+00> : vector<8xf32>
    %18 = vector.multi_reduction <add>, %17, %cst_12 [0] : vector<5x8xf32> to vector<8xf32>
    %19 = vector.shape_cast %18 : vector<8xf32> to vector<1x8xf32>
    %20 = tpu.reciprocal %19 {approx = true} : vector<1x8xf32> -> vector<1x8xf32>
    %21 = arith.mulf %19, %20 : vector<1x8xf32>
    %cst_13 = arith.constant 2.000000e+00 : f32
    %22 = vector.broadcast %cst_13 : f32 to vector<1x8xf32>
    %23 = arith.subf %22, %21 : vector<1x8xf32>
    %24 = arith.mulf %20, %23 : vector<1x8xf32>
    %25 = vector.broadcast %24 : vector<1x8xf32> to vector<5x8xf32>
    %26 = arith.mulf %17, %25 : vector<5x8xf32>
    %c0_14 = arith.constant 0 : index
    %c0_15 = arith.constant 0 : index
    %27 = vector.load %arg6[%c0_14, %c0_15] : memref<5x8xf32, #tpu.memory_space<vmem>>, vector<5x8xf32>
    tpu.vector_store %arg6[%c0_14, %c0_15], %26 {strides = array<i32>} : memref<5x8xf32, #tpu.memory_space<vmem>>, vector<5x8xf32>,
    return
  }
  func.func @transform_0(%arg0: i32) -> (i32, i32) {
    %c0_i32 = arith.constant 0 : i32
    %c0_i32_0 = arith.constant 0 : i32
    return %c0_i32, %arg0 : i32, i32
  }
  func.func @transform_1(%arg0: i32) -> (i32, i32) {
    %c0_i32 = arith.constant 0 : i32
    %c0_i32_0 = arith.constant 0 : i32
    %c0_i32_1 = arith.constant 0 : i32
    return %c0_i32, %c0_i32_0 : i32, i32
  }
  func.func @transform_2(%arg0: i32) -> (i32, i32) {
    %c0_i32 = arith.constant 0 : i32
    %c0_i32_0 = arith.constant 0 : i32
    %c0_i32_1 = arith.constant 0 : i32
    return %c0_i32, %c0_i32_0 : i32, i32
  }
  func.func @transform_3(%arg0: i32) -> (i32, i32) {
    %c0_i32 = arith.constant 0 : i32
    %c0_i32_0 = arith.constant 0 : i32
    %c0_i32_1 = arith.constant 0 : i32
    return %c0_i32, %c0_i32_0 : i32, i32
  }
  func.func @transform_4(%arg0: i32) -> (i32, i32) {
    %c0_i32 = arith.constant 0 : i32
    %c0_i32_0 = arith.constant 0 : i32
    %c0_i32_1 = arith.constant 0 : i32
    return %c0_i32, %c0_i32_0 : i32, i32
  }
  func.func @transform_5(%arg0: i32) -> (i32, i32) {
    %c0_i32 = arith.constant 0 : i32
    %c0_i32_0 = arith.constant 0 : i32
    return %c0_i32, %arg0 : i32, i32
  }
}

</mosaic_0001>

<bundles_post_ra>
// kernel: simple_test_model_forward.1
= control target key start
LH: loop header
LB: loop body
LE: loop exit
PB: predicated region body
PF: predicated region fallthrough
CT: control target
= control target key end

     0   :  { %vm53_vm0 = vcmask 1041408   ;;  %v308_v0 = vmov 0.0|0.0   ;;  %vm309_vm1 = vmmov 1   ;;  %vm310_vm3 = vmmov 0   ;;  %s383_s0 = inlined_call_operand.vmem [shape: f32[10,8], index: 0, kind: input, shape index: {}]   ;;  %s384_s2 = inlined_call_operand.vmem [shape: f32[20,1], index: 2, kind: input, shape index: {}]   ;;  %s385_s1 = inlined_call_operand.vmem [shape: f32[20,10], index: 1, kind: input, shape index: {}]   ;;  %s386_s4 = inlined_call_operand.vmem [shape: f32[5,1], index: 4, kind: input, shape index: {}]   ;;  %s387_s3 = inlined_call_operand.vmem [shape: f32[5,20], index: 3, kind: input, shape index: {}]   ;;  %s388_s5 = inlined_call_operand.vmem [shape: f32[5,8], index: 5, kind: output, shape index: {}]  }
   0x1   :  { %290 = vmatprep.subr.bf16.mxu0 %v308_v0  ;;  %v23_v1 = vld [vmem:[%s383_s0] sm:$0xff]  ;;  %v24_v2 = vld [vmem:[%s383_s0 + $0x8] sm:$0x3]  ;;  %vm292_vm2 = vmpackc.low %vm53_vm0, %vm309_vm1  ;;  %294 = vmatprep.subr.bf16.mxu1 %v308_v0  ;;  %v311_v4 = vmov 0.0   ;;  %v312_v5 = vmov 0   ;;  %vm43_vm4 = vcmask 80896  }
   0x2   :  { %v291_v3 = vpack.c.bf16 %v24_v2, %v23_v1  ;;  %272 = vmatprep.mubr.msk.f32.mxu0 %vm310_vm3, %v311_v4  ;;  %302 = vset.pattern.permute.xlu0 %v312_v5  ;;  %v25_v6 = vld [vmem:[%s384_s2] sm:$0xff]  ;;  %v27_v7 = vld [vmem:[%s384_s2 + $0x10] sm:$0xf]  ;;  %v26_v9 = vld [vmem:[%s384_s2 + $0x8] sm:$0xff]  ;;  %vm151_vm5 = vcmask 1043456   ;;  %vm147_vm6 = vcmask 162816  }
   0x3   :  { %303 = vset.pattern.permute.xlu1 %v312_v5  ;;  %287 = vmatprep.mubr.msk.f32.mxu1 %vm310_vm3, %v311_v4  ;;  %v20_v8 = vld [vmem:[%s385_s1] sm:$0xff]  ;;  %v21_v11 = vld [vmem:[%s385_s1 + $0x8] sm:$0xff]  ;;  %v22_v12 = vld [vmem:[%s385_s1 + $0x10] sm:$0xf]  ;;  %vm225_vm7 = vcmask 61440  }
   0x4   :  { %293 = vmatpush3.bf16.msk.msra.mxu0 %vm292_vm2, %v291_v3  ;;  %30 = vperm.xlu0 %302, %v25_v6   ;;  %v141_v10 = vld [vmem:[%s386_s4] sm:$0x1f] }
   0x5   :  { %40 = vperm.xlu1 %303, %v27_v7   ;;  %v140_v29 = vld [vmem:[%s387_s3] sm:$0x1f] }
   0x7   :  { %273 = vmatmul.mubr.msk.f32.vlgmr.msra.gmra.mrb[0].mxu0 %vm43_vm4, %v20_v8 }
   0x8   :  { %275 = vmatprep.mubr.msk.f32.mxu0 %vm310_vm3, %v311_v4  ;;  %35 = vperm.xlu0 %302, %v26_v9  }
   0x9   :  { %144 = vperm.xlu1 %303, %v141_v10  }
   0xb   :  { %276 = vmatmul.mubr.msk.f32.gmra.mrb[2].mxu0 %vm43_vm4, %v21_v11 }
   0xc   :  { %278 = vmatprep.mubr.msk.f32.mxu0 %vm310_vm3, %v311_v4 }
   0xf   :  { %279 = vmatmul.mubr.msk.f32.gmra.mrb[4].mxu0 %vm43_vm4, %v22_v12 }
  0x83   :  { %v31_v13 = vpop.permute.xlu0 %30 }
  0x84   :  { %v41_v23 = vpop.permute.xlu1 %40 }
  0x87   :  { %v36_v17 = vpop.permute.xlu0 %35 }
  0x88   :  { %v145_v30 = vpop.permute.xlu1 %144 }
  0xda   :  { %v123_v14 = vpop.f32.mrb[0].mxu0 }
  0xdb   :  { %v274_v15 = vpop.f32.mrb[1].mxu0  ;;  %v124_v16 = vadd.f32 %v123_v14, %v31_v13 }
  0xdd   :  { %v137_v21 = vmax.f32 %v124_v16, 0.0 }
  0xde   :  { %v128_v18 = vpop.f32.mrb[2].mxu0 }
  0xdf   :  { %v129_v19 = vadd.f32 %v128_v18, %v36_v17  ;;  %v277_v20 = vpop.f32.mrb[3].mxu0 }
  0xe1   :  { %v138_v22 = vmax.f32 %v129_v19, 0.0 }
  0xe2   :  { %v133_v24 = vpop.f32.mrb[4].mxu0 }
  0xe3   :  { %v134_v25 = vadd.f32 %v133_v24, %v41_v23  ;;  %v280_v26 = vpop.f32.mrb[5].mxu0  ;;  %v295_v27 = vpack.c.bf16 %v138_v22, %v137_v21 }
  0xe5   :  { %v139_v28 = vmax.f32 %v134_v25, 0.0  ;;  %296 = vmatpush3.bf16.msra.mxu1 %v295_v27 }
  0xe6   :  { %285 = vmatprep.subr.mxu1 %v311_v4 }
  0xe9   :  { %286 = vmatpush3.msk.msra.mxu1 %vm151_vm5, %v139_v28 }
  0xea   :  { %288 = vmatmul.mubr.msk.f32.vlgmr.msra.gmra.mrb[0].mxu1 %vm147_vm6, %v140_v29 }
 0x1bd   :  { %v221_v31 = vpop.f32.mrb[0].mxu1 }
 0x1be   :  { %v222_v32 = vadd.f32 %v221_v31, %v145_v30  ;;  %v289_v33 = vpop.f32.mrb[1].mxu1 }
 0x1c0   :  { %v226_v34 = vsel %vm225_vm7, %v222_v32, -inf }
 0x1c1   :  { %v227_v35 = vrot.slane %v226_v34, 4 }
 0x1c3   :  { %v228_v36 = vmax.f32 %v226_v34, %v227_v35 }
 0x1c5   :  { %v229_v37 = vrot.slane %v228_v36, 2 }
 0x1c7   :  { %v230_v38 = vmax.f32 %v228_v36, %v229_v37 }
 0x1c9   :  { %v231_v39 = vrot.slane %v230_v38, 1 }
 0x1cb   :  { %v232_v40 = vmax.f32 %v230_v38, %v231_v39 }
 0x1cd   :  { %v233_v41 = vsub.f32 %v222_v32, %v232_v40 }
 0x1cf   :  { %v234_v42 = vmul.f32 1.442695, %v233_v41 }
 0x1d1   :  { %304 = vpow2.f32 %v234_v42 }
 0x1db   :  { %v305_v43 = vpop.eup %304 }
 0x1dc   :  { %v236_v44 = vsel %vm225_vm7, %v305_v43, 0.0 }
 0x1dd   :  { %v237_v45 = vrot.slane %v236_v44, 4 }
 0x1df   :  { %v238_v46 = vadd.f32 %v237_v45, %v236_v44 }
 0x1e1   :  { %v239_v47 = vrot.slane %v238_v46, 2 }
 0x1e3   :  { %v240_v48 = vadd.f32 %v239_v47, %v238_v46 }
 0x1e5   :  { %v241_v49 = vrot.slane %v240_v48, 1 }
 0x1e7   :  { %v242_v50 = vadd.f32 %v241_v49, %v240_v48 }
 0x1e9   :  { %306 = vrcp.f32 %v242_v50 }
 0x1f3   :  { %v307_v51 = vpop.eup %306 }
 0x1f4   :  { %v244_v52 = vmul.f32 %v307_v51, %v242_v50 }
 0x1f6   :  { %v245_v53 = vsub.f32 2.0, %v244_v52 }
 0x1f8   :  { %v246_v54 = vmul.f32 %v307_v51, %v245_v53 }
 0x1fa   :  { %v247_v55 = vmul.f32 %v305_v43, %v246_v54 }
 0x1fc   :  { %248 = vst.msk [vmem:[%s388_s5] sm:$0x1f] %vm225_vm7, %v247_v55 }

</bundles_post_ra>
